<compile_context>
chip_gen: v7x
topology: tpu7x:2x2x1
jax: 0.10.0
libtpu: 0.0.40
codegen_flags: <defaults>
</compile_context>

<pallas_src>
import jax
import jax.numpy as jnp
from jax import lax
from jax.experimental import pallas as pl
from jax.experimental.pallas import tpu as pltpu


def _dilated_inception_kernel(x_ref, band_ref, bias_ref, o_ref):
    """One M-tile.

    x_ref    : VMEM (TM, Kp)    rows = flattened (n, h), cols = flattened (cin, w_in)
    band_ref : VMEM (Kp, CWp)   banded conv + channel-mix matrix (grid-invariant)
    bias_ref : VMEM (1, CWp)    bias repeated over W_out (grid-invariant)
    o_ref    : VMEM (TM, CWp)   output tile, lane-dense
    """
    o_ref[...] = (
        jnp.dot(x_ref[...], band_ref[...], preferred_element_type=jnp.float32)
        + bias_ref[...]
    ).astype(o_ref.dtype)


def _round_up(v, m):
    return ((v + m - 1) // m) * m


def dilated_inception(x, conv_w, conv_b, dilation_factor=2):
    """Forward pass of dilated_inception (default kernel_set=[7]).

    x      : (N, Cin, H, W)   NCHW float32
    conv_w : (Cout, Cin, 1, K) OIHW conv weight (K = 7)
    conv_b : (Cout,)           bias
    returns: (N, Cout, H, W_out),  W_out = W - dilation_factor * (K - 1)
    """
    # TODO(synk): only the default kernel_set=[7] is implemented; multi-kernel
    # configs (per-branch slice + channel cat) are not handled.
    N, Cin, H, W = x.shape
    Cout, Cin_w, kh, K = conv_w.shape
    assert Cin_w == Cin and kh == 1
    W_out = W - dilation_factor * (K - 1)
    assert W_out > 0, "input too short for the dilated kernel"

    CW = Cout * W_out
    CinW = Cin * W
    M = N * H

    Kp = _round_up(CinW, 128)          # contraction dim, lane-aligned
    CWp = _round_up(CW, 128)           # output dim, lane-dense -> unmasked stores
    TM = min(256, _round_up(M, 8))     # M tile (multiple of 8 sublanes)
    Mp = _round_up(M, TM)

    # Banded matrix: band[i*W + (d*k + w), o*W_out + w] = conv_w[o, i, 0, k]
    # so that (x2 @ band)[m, o*W_out + w] = sum_{i,k} w[o,i,k] * x[n,i,h, w + d*k],
    # i.e. exactly nn.Conv2d's dilated cross-correlation + channel mix.
    w_oik = conv_w[:, :, 0, :].astype(jnp.float32)                      # (Cout, Cin, K)
    rows = dilation_factor * jnp.arange(K)[:, None] + jnp.arange(W_out)[None, :]
    onehot = jax.nn.one_hot(rows, W, dtype=jnp.float32)                 # (K, W_out, W)
    band = jnp.einsum('oik,kwr->irow', w_oik, onehot)                   # (Cin, W, Cout, W_out)
    band = band.reshape(CinW, CW)
    band = jnp.pad(band, ((0, Kp - CinW), (0, CWp - CW)))               # zero pad

    bias = jnp.repeat(conv_b.astype(jnp.float32), W_out).reshape(1, CW)
    bias = jnp.pad(bias, ((0, 0), (0, CWp - CW)))                       # zero pad

    # (N, Cin, H, W) -> (N*H, Cin*W): the conv is independent per (n, h).
    x2 = x.transpose(0, 2, 1, 3).reshape(M, CinW).astype(jnp.float32)
    x2 = jnp.pad(x2, ((0, Mp - M), (0, Kp - CinW)))

    out_flat = pl.pallas_call(
        _dilated_inception_kernel,
        out_shape=jax.ShapeDtypeStruct((Mp, CWp), jnp.float32),
        grid=(Mp // TM,),
        in_specs=[
            pl.BlockSpec((TM, Kp), lambda m: (m, 0)),                   # x tile (pipelined)
            pl.BlockSpec(memory_space=pltpu.MemorySpace.VMEM),          # band: resident, no double-buffer
            pl.BlockSpec(memory_space=pltpu.MemorySpace.VMEM),          # bias: resident
        ],
        out_specs=pl.BlockSpec((TM, CWp), lambda m: (m, 0)),
        compiler_params=pltpu.CompilerParams(
            dimension_semantics=("parallel",)),
    )(x2, band, bias)

    # Drop padding, restore PyTorch's NCHW output layout (cheap, on the small output).
    out = out_flat[:M, :CW].reshape(N, H, Cout, W_out).transpose(0, 2, 1, 3)
    return out.astype(x.dtype)


# ---------------------------------------------------------------------------
# Pure-JAX reference (mirrors the PyTorch module) for checking.
# ---------------------------------------------------------------------------
def _dilated_inception_ref(x, conv_w, conv_b, dilation_factor=2):
    out = lax.conv_general_dilated(
        x, conv_w, window_strides=(1, 1), padding='VALID',
        rhs_dilation=(1, dilation_factor),
        dimension_numbers=('NCHW', 'OIHW', 'NCHW'),
        precision=lax.Precision.HIGHEST)
    out = out + conv_b[None, :, None, None]
    # kernel_set=[7]: the per-branch slicing and torch.cat are the identity.
    return out


if __name__ == "__main__":
    key = jax.random.PRNGKey(0)
    kx, kw, kb = jax.random.split(key, 3)

    # W_out = 28 - 2*(7-1) = 16; Cout*W_out = 192 -> padded to 256,
    # Cin*W = 112 -> padded to 128, M = N*H = 20 -> padded to 24.
    N, Cin, Cout, H, W = 2, 4, 12, 10, 28
    K, dilation = 7, 2

    x = jax.random.normal(kx, (N, Cin, H, W), jnp.float32)
    conv_w = jax.random.normal(kw, (Cout, Cin, 1, K), jnp.float32) * 0.1
    conv_b = jax.random.normal(kb, (Cout,), jnp.float32) * 0.1

    out = jax.block_until_ready(dilated_inception(x, conv_w, conv_b, dilation))
    ref = jax.block_until_ready(_dilated_inception_ref(x, conv_w, conv_b, dilation))

    assert out.shape == (N, Cout, H, W - dilation * (K - 1)), out.shape
    max_err = float(jnp.max(jnp.abs(out - ref)))
    assert jnp.allclose(out, ref, atol=1e-3, rtol=1e-3), max_err

    print("KERNEL_OK")
</pallas_src>

<mosaic_0001>
module attributes {stable_mosaic.version = 11 : i64} {
  func.func @_dilated_inception_kernel(%arg0: i32, %arg1: memref<24x128xf32, #tpu.memory_space<vmem>>, %arg2: memref<128x256xf32, #tpu.memory_space<vmem>>, %arg3: memref<1x256xf32, #tpu.memory_space<vmem>>, %arg4: memref<24x256xf32, #tpu.memory_space<vmem>>) attributes {dimension_semantics = [#tpu.dimension_semantics<parallel>], iteration_bounds = array<i64: 1>, scalar_prefetch = 0 : i64, scratch_operands = 0 : i64, tpu.core_type = #tpu.core_type<tc>, window_params = [{transform_indices = @transform_0, window_bounds = array<i64: 24, 128>}, {pipeline_mode = #tpu.pipeline_mode<synchronous>, transform_indices = @transform_1, window_bounds = array<i64: 128, 256>}, {pipeline_mode = #tpu.pipeline_mode<synchronous>, transform_indices = @transform_2, window_bounds = array<i64: 1, 256>}, {transform_indices = @transform_3, window_bounds = array<i64: 24, 256>}]} {
    %c0 = arith.constant 0 : index
    %c0_0 = arith.constant 0 : index
    %0 = vector.load %arg1[%c0, %c0_0] : memref<24x128xf32, #tpu.memory_space<vmem>>, vector<24x128xf32>
    %c0_1 = arith.constant 0 : index
    %c0_2 = arith.constant 0 : index
    %1 = vector.load %arg2[%c0_1, %c0_2] : memref<128x256xf32, #tpu.memory_space<vmem>>, vector<128x256xf32>
    %cst = arith.constant dense<0.000000e+00> : vector<24x256xf32>
    %2 = tpu.matmul %0, %1, %cst {dimension_numbers = #tpu.dot_dimension_numbers<[1], [0], [0], [1], [0, 0, 1, 1], [], []>} : vector<24x128xf32>, vector<128x256xf32>, vector<24x256xf32> -> vector<24x256xf32>
    %c0_3 = arith.constant 0 : index
    %c0_4 = arith.constant 0 : index
    %3 = vector.load %arg3[%c0_3, %c0_4] : memref<1x256xf32, #tpu.memory_space<vmem>>, vector<1x256xf32>
    %4 = vector.broadcast %3 : vector<1x256xf32> to vector<24x256xf32>
    %5 = arith.addf %2, %4 : vector<24x256xf32>
    %c0_5 = arith.constant 0 : index
    %c0_6 = arith.constant 0 : index
    %6 = vector.load %arg4[%c0_5, %c0_6] : memref<24x256xf32, #tpu.memory_space<vmem>>, vector<24x256xf32>
    tpu.vector_store %arg4[%c0_5, %c0_6], %5 {strides = array<i32>} : memref<24x256xf32, #tpu.memory_space<vmem>>, vector<24x256xf32>,
    return
  }
  func.func @transform_0(%arg0: i32) -> (i32, i32) {
    %c0_i32 = arith.constant 0 : i32
    %c0_i32_0 = arith.constant 0 : i32
    return %arg0, %c0_i32 : i32, i32
  }
  func.func @transform_1(%arg0: i32) -> (i32, i32) {
    %c0_i32 = arith.constant 0 : i32
    %c0_i32_0 = arith.constant 0 : i32
    %c0_i32_1 = arith.constant 0 : i32
    return %c0_i32, %c0_i32_0 : i32, i32
  }
  func.func @transform_2(%arg0: i32) -> (i32, i32) {
    %c0_i32 = arith.constant 0 : i32
    %c0_i32_0 = arith.constant 0 : i32
    %c0_i32_1 = arith.constant 0 : i32
    return %c0_i32, %c0_i32_0 : i32, i32
  }
  func.func @transform_3(%arg0: i32) -> (i32, i32) {
    %c0_i32 = arith.constant 0 : i32
    %c0_i32_0 = arith.constant 0 : i32
    return %arg0, %c0_i32 : i32, i32
  }
}

</mosaic_0001>

<bundles_post_ra>
// kernel: tpu_custom_call.1
= control target key start
LH: loop header
LB: loop body
LE: loop exit
PB: predicated region body
PF: predicated region fallthrough
CT: control target
= control target key end

     0   :  { %8 = vsyncpa [#allocation3], 0  ;;  %s401_s0 = inlined_call_operand.hbm [shape: f32[24,128], index: 0, kind: input, shape index: {}]   ;;  %s402_s1 = inlined_call_operand.hbm [shape: f32[128,256], index: 1, kind: input, shape index: {}]   ;;  %s403_s2 = inlined_call_operand.vmem [shape: f32[1,256], index: 2, kind: input, shape index: {}]   ;;  %s404_s3 = inlined_call_operand.hbm [shape: f32[24,256], index: 3, kind: output, shape index: {}]  }
   0x1   :  { %9 = vsyncpa [#allocation6], 0 }
   0x2   :  { %10 = vsyncpa [#allocation4], 0  ;;  %s325_s12 = smov [#allocation2]   ;;  %s253_s16 = scalar_lea.hbm %s401_s0, 384 }
   0x3   :  { %s16_s13 = sshll.u32 %s325_s12, 4  ;;  %p254_p0 = scmp.ne.s32.totalorder %s401_s0, %s253_s16  ;;  %s17_s13 = int_to_ptr.vmem [resolvable:$true] %s16_s13 }
   0x4   :  { %p257_p1 = scmp.lt.u32.totalorder %s253_s16, %s401_s0 }
   0x6   :  { %p259_p2 = pnand %p257_p1, %p254_p0 }
   0x8   :  { %262 = shalt.err (!%p259_p2)
}
   0x9   :  { %s263_s21 = scalar_lea.vmem %s17_s13, 384  ;;  %p268_p4 = scmp.lt.s32.totalorder %s17_s13, %s17_s13 }
   0xa   :  { %p264_p3 = scmp.ne.s32.totalorder %s17_s13, %s263_s21  ;;  %p269_p5 = scmp.lt.s32.totalorder %s263_s21, %s263_s21 }
   0xc   :  { %p270_p6 = por %p269_p5, %p268_p4 }
   0xe   :  { %p271_p7 = pnand %p270_p6, %p264_p3 }
  0x10   :  { %274 = shalt.err (!%p271_p7)
}
  0x11   :  { %s326_s22 = smov 128   ;;  %s327_s23 = smov 8  }
  0x12   :  { %22 = dma.hbm_to_vmem [thread:$0]  %s401_s0, 384, %s17_s13, [#allocation3], %s326_s22, %s326_s22, %s327_s23  }
  0x13   :  { %s328_s26 = smov [#allocation5]   ;;  %s275_s30 = scalar_lea.hbm %s402_s1, 4096 }
  0x14   :  { %s28_s27 = sshll.u32 %s328_s26, 4  ;;  %p276_p8 = scmp.ne.s32.totalorder %s402_s1, %s275_s30  ;;  %s29_s27 = int_to_ptr.vmem [resolvable:$true] %s28_s27 }
  0x15   :  { %p279_p9 = scmp.lt.u32.totalorder %s275_s30, %s402_s1 }
  0x17   :  { %p281_p10 = pnand %p279_p9, %p276_p8 }
  0x19   :  { %284 = shalt.err (!%p281_p10)
}
  0x1a   :  { %s285_s8 = scalar_lea.vmem %s29_s27, 4096  ;;  %p290_p12 = scmp.lt.s32.totalorder %s29_s27, %s29_s27 }
  0x1b   :  { %p286_p11 = scmp.ne.s32.totalorder %s29_s27, %s285_s8  ;;  %p291_p13 = scmp.lt.s32.totalorder %s285_s8, %s285_s8 }
  0x1d   :  { %p292_p0 = por %p291_p13, %p290_p12 }
  0x1f   :  { %p293_p1 = pnand %p292_p0, %p286_p11 }
  0x21   :  { %296 = shalt.err (!%p293_p1)
}
  0x22   :  { %s329_s0 = smov 256   ;;  %s330_s9 = smov 16  }
  0x23   :  { %34 = dma.hbm_to_vmem [thread:$0]  %s402_s1, 4096, %s29_s27, [#allocation6], %s329_s0, %s329_s0, %s330_s9  }
  0x24   :  { %319 = dma.done.wait [#allocation3], 384  }
  0x25   :  { %320 = vsyncadd [#allocation3], 4294966912 }
  0x26   :  { %321 = dma.done.wait [#allocation6], 4096  }
  0x27   :  { %322 = vsyncadd [#allocation6], 4294963200  ;;  %v331_v0 = vmov 0.0   ;;  %v47_v1 = vld [vmem:[#allocation5 + $0x8] sm:$0xff]  ;;  %v49_v2 = vld [vmem:[#allocation5 + $0x18] sm:$0xff]  ;;  %v80_v52 = vlaneseq  ;;  %s332_s13 = smov [#allocation7]  }
  0x28   :  { %160 = vmatprep.mubr.f32.mxu1 %v331_v0  ;;  %154 = vmatprep.mubr.f32.mxu0 %v331_v0  ;;  %v46_v3 = vld [vmem:[#allocation5] sm:$0xff]  ;;  %v197_v4 = vpack.c.bf16 %v49_v2, %v47_v1  ;;  %v48_v5 = vld [vmem:[#allocation5 + $0x10] sm:$0xff]  ;;  %v51_v6 = vld [vmem:[#allocation5 + $0x28] sm:$0xff]  ;;  %s184_s14 = sshll.u32 %s332_s13, 4  ;;  %s185_s14 = int_to_ptr.vmem [resolvable:$true] %s184_s14 }
  0x29   :  { %v53_v7 = vld [vmem:[#allocation5 + $0x38] sm:$0xff]  ;;  %v199_v8 = vpack.c.bf16 %v48_v5, %v46_v3  ;;  %v50_v10 = vld [vmem:[#allocation5 + $0x20] sm:$0xff]  ;;  %v52_v11 = vld [vmem:[#allocation5 + $0x30] sm:$0xff]  ;;  %v81_v53 = vshrl.u32 %v80_v52, 7  ;;  %p302_p3 = scmp.lt.s32.totalorder %s185_s14, %s185_s14 }
  0x2a   :  { %v201_v9 = vpack.c.bf16 %v53_v7, %v51_v6  ;;  %v55_v12 = vld [vmem:[#allocation5 + $0x48] sm:$0xff]  ;;  %229 = vmatprep.subr.bf16.mxu1 %v197_v4  ;;  %198 = vmatprep.subr.bf16.mxu0 %v197_v4  ;;  %v57_v13 = vld [vmem:[#allocation5 + $0x58] sm:$0xff]  ;;  %v203_v14 = vpack.c.bf16 %v52_v11, %v50_v10  ;;  %v54_v16 = vld [vmem:[#allocation5 + $0x40] sm:$0xff] }
  0x2b   :  { %237 = vmatpush1.bf16.msra.mxu1 %v199_v8  ;;  %200 = vmatpush1.bf16.msra.mxu0 %v199_v8  ;;  %v205_v15 = vpack.c.bf16 %v57_v13, %v55_v12  ;;  %v56_v17 = vld [vmem:[#allocation5 + $0x50] sm:$0xff]  ;;  %v59_v18 = vld [vmem:[#allocation5 + $0x68] sm:$0xff]  ;;  %v61_v19 = vld [vmem:[#allocation5 + $0x78] sm:$0xff]  ;;  %v82_v54 = vsub.s32 0, %v81_v53  ;;  %v86_v56 = vsub.s32 1, %v81_v53 }
  0x2c   :  { %230 = vmatprep.subr.bf16.mxu1 %v201_v9  ;;  %202 = vmatprep.subr.bf16.mxu0 %v201_v9  ;;  %v207_v20 = vpack.c.bf16 %v56_v17, %v54_v16  ;;  %v209_v21 = vpack.c.bf16 %v61_v19, %v59_v18  ;;  %v58_v22 = vld [vmem:[#allocation5 + $0x60] sm:$0xff]  ;;  %v60_v23 = vld [vmem:[#allocation5 + $0x70] sm:$0xff]  ;;  %v63_v24 = vld [vmem:[#allocation5 + $0x88] sm:$0xff] }
  0x2d   :  { %v65_v25 = vld [vmem:[#allocation5 + $0x98] sm:$0xff]  ;;  %v211_v26 = vpack.c.bf16 %v60_v23, %v58_v22  ;;  %v62_v28 = vld [vmem:[#allocation5 + $0x80] sm:$0xff]  ;;  %v64_v29 = vld [vmem:[#allocation5 + $0x90] sm:$0xff] }
  0x2e   :  { %v213_v27 = vpack.c.bf16 %v65_v25, %v63_v24  ;;  %v67_v30 = vld [vmem:[#allocation5 + $0xa8] sm:$0xff]  ;;  %v69_v31 = vld [vmem:[#allocation5 + $0xb8] sm:$0xff]  ;;  %v215_v32 = vpack.c.bf16 %v64_v29, %v62_v28  ;;  %v66_v34 = vld [vmem:[#allocation5 + $0xa0] sm:$0xff] }
  0x2f   :  { %238 = vmatpush1.bf16.msra.mxu1 %v203_v14  ;;  %204 = vmatpush1.bf16.msra.mxu0 %v203_v14  ;;  %v217_v33 = vpack.c.bf16 %v69_v31, %v67_v30  ;;  %v68_v35 = vld [vmem:[#allocation5 + $0xb0] sm:$0xff]  ;;  %v71_v36 = vld [vmem:[#allocation5 + $0xc8] sm:$0xff]  ;;  %v73_v37 = vld [vmem:[#allocation5 + $0xd8] sm:$0xff] }
  0x30   :  { %231 = vmatprep.subr.bf16.mxu1 %v205_v15  ;;  %206 = vmatprep.subr.bf16.mxu0 %v205_v15  ;;  %v219_v38 = vpack.c.bf16 %v68_v35, %v66_v34  ;;  %v221_v39 = vpack.c.bf16 %v73_v37, %v71_v36  ;;  %v70_v40 = vld [vmem:[#allocation5 + $0xc0] sm:$0xff]  ;;  %v72_v41 = vld [vmem:[#allocation5 + $0xd0] sm:$0xff]  ;;  %v75_v42 = vld [vmem:[#allocation5 + $0xe8] sm:$0xff] }
  0x31   :  { %v77_v43 = vld [vmem:[#allocation5 + $0xf8] sm:$0xff]  ;;  %v223_v44 = vpack.c.bf16 %v72_v41, %v70_v40  ;;  %v74_v46 = vld [vmem:[#allocation5 + $0xe0] sm:$0xff]  ;;  %v76_v47 = vld [vmem:[#allocation5 + $0xf0] sm:$0xff] }
  0x32   :  { %v225_v45 = vpack.c.bf16 %v77_v43, %v75_v42  ;;  %v227_v48 = vpack.c.bf16 %v76_v47, %v74_v46  ;;  %v44_v49 = vld [vmem:[#allocation2 + $0x8] sm:$0xff]  ;;  %v43_v50 = vld [vmem:[#allocation2] sm:$0xff]  ;;  %v45_v51 = vld [vmem:[#allocation2 + $0x10] sm:$0xff] }
  0x33   :  { %239 = vmatpush1.bf16.msra.mxu1 %v207_v20  ;;  %208 = vmatpush1.bf16.msra.mxu0 %v207_v20  ;;  %v78_v55 = vld [vmem:[%s403_s2] sm:$0x3]  ;;  %s297_s2 = scalar_lea.vmem %s185_s14, 768 }
  0x34   :  { %232 = vmatprep.subr.bf16.mxu1 %v209_v21  ;;  %210 = vmatprep.subr.bf16.mxu0 %v209_v21  ;;  %v83_v57 = vrot.slane %v78_v55, %v82_v54  ;;  %v87_v58 = vrot.slane %v78_v55, %v86_v56  ;;  %p298_p2 = scmp.ne.s32.totalorder %s185_s14, %s297_s2  ;;  %p303_p4 = scmp.lt.s32.totalorder %s297_s2, %s297_s2 }
  0x36   :  { %p304_p5 = por %p303_p4, %p302_p3 }
  0x37   :  { %240 = vmatpush1.bf16.msra.mxu1 %v211_v26  ;;  %212 = vmatpush1.bf16.msra.mxu0 %v211_v26 }
  0x38   :  { %233 = vmatprep.subr.bf16.mxu1 %v213_v27  ;;  %214 = vmatprep.subr.bf16.mxu0 %v213_v27  ;;  %p305_p6 = pnand %p304_p5, %p298_p2 }
  0x3b   :  { %241 = vmatpush1.bf16.msra.mxu1 %v215_v32  ;;  %216 = vmatpush1.bf16.msra.mxu0 %v215_v32 }
  0x3c   :  { %234 = vmatprep.subr.bf16.mxu1 %v217_v33  ;;  %218 = vmatprep.subr.bf16.mxu0 %v217_v33 }
  0x3f   :  { %242 = vmatpush1.bf16.msra.mxu1 %v219_v38  ;;  %220 = vmatpush1.bf16.msra.mxu0 %v219_v38 }
  0x40   :  { %235 = vmatprep.subr.bf16.mxu1 %v221_v39  ;;  %222 = vmatprep.subr.bf16.mxu0 %v221_v39 }
  0x43   :  { %243 = vmatpush1.bf16.msra.mxu1 %v223_v44  ;;  %224 = vmatpush1.bf16.msra.mxu0 %v223_v44 }
  0x44   :  { %236 = vmatprep.subr.bf16.mxu1 %v225_v45  ;;  %226 = vmatprep.subr.bf16.mxu0 %v225_v45 }
  0x47   :  { %244 = vmatpush1.bf16.msra.mxu1 %v227_v48  ;;  %228 = vmatpush1.bf16.msra.mxu0 %v227_v48 }
  0x4a   :  { %161 = vmatmul.mubr.f32.vlgmr.msra.gmra.mrb[0].mxu1 %v44_v49  ;;  %155 = vmatmul.mubr.f32.vlgmr.msra.gmra.mrb[0].mxu0 %v43_v50 }
  0x4b   :  { %166 = vmatprep.mubr.f32.mxu1 %v331_v0 }
  0x4e   :  { %167 = vmatmul.mubr.f32.gmra.mrb[2].mxu1 %v45_v51 }
 0x11d   :  { %v162_v59 = vpop.f32.mrb[0].mxu1  ;;  %v156_v60 = vpop.f32.mrb[0].mxu0 }
 0x11e   :  { %v163_v61 = vadd.f32 %v162_v59, %v83_v57  ;;  %v164_v62 = vpop.f32.mrb[1].mxu1  ;;  %v157_v63 = vadd.f32 %v156_v60, %v83_v57  ;;  %v158_v1 = vpop.f32.mrb[1].mxu0 }
 0x11f   :  { %v165_v2 = vadd.f32 %v164_v62, %v87_v58  ;;  %v159_v0 = vadd.f32 %v158_v1, %v87_v58 }
 0x120   :  { %175 = vst [vmem:[#allocation7 + $0x10] sm:$0xff] %v163_v61  ;;  %173 = vst [vmem:[#allocation7] sm:$0xff] %v157_v63 }
 0x121   :  { %176 = vst [vmem:[#allocation7 + $0x18] sm:$0xff] %v165_v2  ;;  %174 = vst [vmem:[#allocation7 + $0x8] sm:$0xff] %v159_v0  ;;  %v168_v3 = vpop.f32.mrb[2].mxu1 }
 0x122   :  { %v169_v4 = vadd.f32 %v168_v3, %v83_v57  ;;  %v170_v5 = vpop.f32.mrb[3].mxu1 }
 0x123   :  { %v171_v6 = vadd.f32 %v170_v5, %v87_v58 }
 0x124   :  { %177 = vst [vmem:[#allocation7 + $0x20] sm:$0xff] %v169_v4 }
 0x125   :  { %178 = vst [vmem:[#allocation7 + $0x28] sm:$0xff] %v171_v6 }
 0x126   :  { %308 = shalt.err (!%p305_p6)
}
 0x127   :  { %s309_s17 = scalar_lea.hbm %s404_s3, 768 }
 0x128   :  { %p310_p7 = scmp.ne.s32.totalorder %s404_s3, %s309_s17  ;;  %p313_p8 = scmp.lt.u32.totalorder %s309_s17, %s404_s3 }
 0x12a   :  { %p315_p9 = pnand %p313_p8, %p310_p7 }
 0x12c   :  { %318 = shalt.err (!%p315_p9)
}
 0x12d   :  { %190 = dma.vmem_to_hbm [thread:$0]  %s185_s14, 768, %s404_s3, [#allocation4], %s329_s0, %s329_s0, %s330_s9  }
 0x12e   :  { %323 = dma.done.wait [#allocation4], 768  }
 0x12f   :  { %324 = vsyncadd [#allocation4], 4294966528 }
 0x130   :  { %194 = vsyncpa [#allocation3], 1 }
 0x131   :  { %195 = vsyncpa [#allocation6], 1 }
 0x132   :  { %196 = vsyncpa [#allocation4], 1 }

</bundles_post_ra>
